<compile_context>
chip_gen: v7x
topology: tpu7x:2x2x1
jax: 0.10.0
libtpu: 0.0.40
codegen_flags: <defaults>
</compile_context>

<pallas_src>
import jax
import jax.numpy as jnp
from jax import lax
from jax.experimental import pallas as pl
from jax.experimental.pallas import tpu as pltpu


def lstm_block_kernel(xp_ref,            # (T*B, 2D)  rows time-major; cols [x_fwd | x_rev(time-reversed)]
                      wih_ref,           # (2D, 8H)   gate-interleaved input weights, both dirs
                      bias_ref,          # (1, 8H)    combined b_ih+b_hh, both dirs, gate-interleaved
                      whh_ref,           # (2H, 8H)   gate-interleaved recurrent weights, both dirs
                      fc1w_ref, fc1b_ref,   # (2H, F1), (1, F1)
                      fc2w_ref, fc2b_ref,   # (F1, F2), (1, F2)
                      out_ref,           # (B, F2)
                      xproj_ref):        # VMEM scratch (T*B, 8H)
    TB = xp_ref.shape[0]
    B = out_ref.shape[0]
    T = TB // B
    H2 = whh_ref.shape[0]      # 2H  (packed [fwd | rev])

    # ---- hoisted input projection: one GEMM for all timesteps & both directions,
    #      with the (b_ih + b_hh) biases folded in.  Removes 2*T tiny matmuls and
    #      2*T bias broadcasts from the serial recurrence.
    xproj_ref[...] = (jnp.dot(xp_ref[...], wih_ref[...],
                              preferred_element_type=jnp.float32)
                      + bias_ref[...])

    def step(t, carry):
        h, c = carry                                   # (B, 2H) packed [h_f | h_r]
        row = pl.multiple_of(t * B, B)                 # sublane-aligned monotone stream
        gates = (xproj_ref[pl.ds(row, B), :]
                 + jnp.dot(h, whh_ref[...], preferred_element_type=jnp.float32))
        # gate layout: [i_f i_r | f_f f_r | g_f g_r | o_f o_r], each block 2H wide
        i = jax.nn.sigmoid(gates[:, 0 * H2:1 * H2])
        f = jax.nn.sigmoid(gates[:, 1 * H2:2 * H2])
        g = jnp.tanh(gates[:, 2 * H2:3 * H2])
        o = jax.nn.sigmoid(gates[:, 3 * H2:4 * H2])
        c_new = f * c + i * g
        h_new = o * jnp.tanh(c_new)
        return h_new, c_new

    zero = jnp.zeros((B, H2), jnp.float32)
    # T is static and tiny -> fully unroll so MXU/EUP/VPU work from adjacent
    # steps can overlap under the LLO scheduler.
    h_cat, _ = lax.fori_loop(0, T, step, (zero, zero), unroll=True)
    # h_cat == concat(h_fwd_final, h_rev_final) already — no concat needed.

    y = jnp.dot(h_cat, fc1w_ref[...], preferred_element_type=jnp.float32) + fc1b_ref[...]
    y = jnp.maximum(y, 0.0)                            # relu(fc1(.))
    # dropout == identity in eval mode
    y = jnp.dot(y, fc2w_ref[...], preferred_element_type=jnp.float32) + fc2b_ref[...]
    y = jnp.maximum(y, 0.0)                            # relu(fc2(.))

    out_ref[...] = y.astype(out_ref.dtype)


def _interleave_gate_columns(wf_t, wr_t, H):
    """Build the fused block weight.

    wf_t: (Kf, 4H), wr_t: (Kr, 4H) — PyTorch gate order (i, f, g, o), pre-transposed.
    Returns (Kf+Kr, 8H): forward rows feed the even gate blocks, reverse rows feed
    the odd gate blocks, giving packed gate layout [i_f i_r f_f f_r g_f g_r o_f o_r].
    """
    Kf = wf_t.shape[0]
    Kr = wr_t.shape[0]
    out = jnp.zeros((Kf + Kr, 8 * H), wf_t.dtype)
    for k in range(4):
        out = out.at[:Kf, (2 * k) * H:(2 * k + 1) * H].set(wf_t[:, k * H:(k + 1) * H])
        out = out.at[Kf:, (2 * k + 1) * H:(2 * k + 2) * H].set(wr_t[:, k * H:(k + 1) * H])
    return out


def _interleave_gate_bias(bf, br, H):
    out = jnp.zeros((8 * H,), bf.dtype)
    for k in range(4):
        out = out.at[(2 * k) * H:(2 * k + 1) * H].set(bf[k * H:(k + 1) * H])
        out = out.at[(2 * k + 1) * H:(2 * k + 2) * H].set(br[k * H:(k + 1) * H])
    return out.reshape(1, 8 * H)


def lstm_block_forward(x, params):
    """x: (B, T, D) float32, batch_first like the PyTorch module."""
    B, T, D = x.shape
    H = params["w_hh_f"].shape[1]
    F1 = params["fc1_w"].shape[0]
    F2 = params["fc2_w"].shape[0]

    x = x.astype(jnp.float32)
    x_tm = jnp.transpose(x, (1, 0, 2))       # (T, B, D) time-major, forward stream
    x_rev = x_tm[::-1]                       # reverse stream, already time-reversed
    # Pack [fwd | rev] along features so a single GEMM projects both directions,
    # and flatten (T, B) -> rows so the kernel needs no in-kernel reshape.
    x_pack = jnp.concatenate([x_tm, x_rev], axis=-1).reshape(T * B, 2 * D)

    wih_blk = _interleave_gate_columns(params["w_ih_f"].T, params["w_ih_r"].T, H)   # (2D, 8H)
    whh_blk = _interleave_gate_columns(params["w_hh_f"].T, params["w_hh_r"].T, H)   # (2H, 8H)
    bias_blk = _interleave_gate_bias(params["b_ih_f"] + params["b_hh_f"],
                                     params["b_ih_r"] + params["b_hh_r"], H)        # (1, 8H)

    args = (
        x_pack, wih_blk, bias_blk, whh_blk,
        params["fc1_w"].T, params["fc1_b"].reshape(1, F1),
        params["fc2_w"].T, params["fc2_b"].reshape(1, F2),
    )

    vmem = pl.BlockSpec(memory_space=pltpu.MemorySpace.VMEM)
    return pl.pallas_call(
        lstm_block_kernel,
        out_shape=jax.ShapeDtypeStruct((B, F2), jnp.float32),
        in_specs=[vmem] * len(args),
        out_specs=vmem,
        scratch_shapes=[pltpu.VMEM((T * B, 8 * H), jnp.float32)],
    )(*args)


def lstm_block_reference(x, params):
    """Pure-JAX reference matching torch.nn.LSTM(bidirectional) + fc1/fc2 semantics."""
    B, T, D = x.shape
    H = params["w_hh_f"].shape[1]

    def run_dir(xs, wih, whh, bih, bhh):
        h = jnp.zeros((B, H), jnp.float32)
        c = jnp.zeros((B, H), jnp.float32)
        for t in range(xs.shape[1]):
            g = xs[:, t] @ wih.T + h @ whh.T + bih + bhh
            i = jax.nn.sigmoid(g[:, :H])
            f = jax.nn.sigmoid(g[:, H:2 * H])
            gg = jnp.tanh(g[:, 2 * H:3 * H])
            o = jax.nn.sigmoid(g[:, 3 * H:])
            c = f * c + i * gg
            h = o * jnp.tanh(c)
        return h

    hf = run_dir(x, params["w_ih_f"], params["w_hh_f"], params["b_ih_f"], params["b_hh_f"])
    hr = run_dir(x[:, ::-1], params["w_ih_r"], params["w_hh_r"], params["b_ih_r"], params["b_hh_r"])
    h_cat = jnp.concatenate([hf, hr], axis=1)
    y = jnp.maximum(h_cat @ params["fc1_w"].T + params["fc1_b"], 0.0)
    y = jnp.maximum(y @ params["fc2_w"].T + params["fc2_b"], 0.0)
    return y


def init_params(key, input_dim, hidden_dim, fc1_out, fc2_out):
    """Deterministic init mirroring PyTorch default shapes (uniform(-k, k))."""
    keys = jax.random.split(key, 12)
    k_lstm = 1.0 / jnp.sqrt(hidden_dim)

    def u(k, shape, bound):
        return jax.random.uniform(k, shape, jnp.float32, -bound, bound)

    return {
        "w_ih_f": u(keys[0], (4 * hidden_dim, input_dim), k_lstm),
        "w_hh_f": u(keys[1], (4 * hidden_dim, hidden_dim), k_lstm),
        "b_ih_f": u(keys[2], (4 * hidden_dim,), k_lstm),
        "b_hh_f": u(keys[3], (4 * hidden_dim,), k_lstm),
        "w_ih_r": u(keys[4], (4 * hidden_dim, input_dim), k_lstm),
        "w_hh_r": u(keys[5], (4 * hidden_dim, hidden_dim), k_lstm),
        "b_ih_r": u(keys[6], (4 * hidden_dim,), k_lstm),
        "b_hh_r": u(keys[7], (4 * hidden_dim,), k_lstm),
        "fc1_w": u(keys[8], (fc1_out, 2 * hidden_dim), 1.0 / jnp.sqrt(2 * hidden_dim)),
        "fc1_b": u(keys[9], (fc1_out,), 1.0 / jnp.sqrt(2 * hidden_dim)),
        "fc2_w": u(keys[10], (fc2_out, fc1_out), 1.0 / jnp.sqrt(fc1_out)),
        "fc2_b": u(keys[11], (fc2_out,), 1.0 / jnp.sqrt(fc1_out)),
    }


if __name__ == "__main__":
    # Small shapes consistent with the module's forward.  Batch=8 (not 2) so
    # (B, .) tiles fill all 8 f32 sublanes per the performance review.
    B, T, D = 8, 8, 16
    H, F1, F2 = 32, 32, 16

    key = jax.random.PRNGKey(0)
    kx, kp = jax.random.split(key)
    x = jax.random.normal(kx, (B, T, D), jnp.float32)
    params = init_params(kp, D, H, F1, F2)

    out = lstm_block_forward(x, params)
    out = jax.block_until_ready(out)

    ref = jax.block_until_ready(lstm_block_reference(x, params))
    assert out.shape == (B, F2), out.shape
    assert jnp.allclose(out, ref, rtol=1e-4, atol=1e-4), (
        f"max abs diff {jnp.max(jnp.abs(out - ref))}")

    print("KERNEL_OK")
</pallas_src>

<mosaic_0001>
module attributes {stable_mosaic.version = 11 : i64} {
  func.func @lstm_block_kernel(%arg0: memref<64x32xf32, #tpu.memory_space<vmem>>, %arg1: memref<32x256xf32, #tpu.memory_space<vmem>>, %arg2: memref<1x256xf32, #tpu.memory_space<vmem>>, %arg3: memref<64x256xf32, #tpu.memory_space<vmem>>, %arg4: memref<64x32xf32, #tpu.memory_space<vmem>>, %arg5: memref<1x32xf32, #tpu.memory_space<vmem>>, %arg6: memref<32x16xf32, #tpu.memory_space<vmem>>, %arg7: memref<1x16xf32, #tpu.memory_space<vmem>>, %arg8: memref<8x16xf32, #tpu.memory_space<vmem>>, %arg9: memref<64x256xf32, #tpu.memory_space<vmem>>) attributes {dimension_semantics = [], scalar_prefetch = 0 : i64, scratch_operands = 1 : i64, tpu.core_type = #tpu.core_type<tc>} {
    %c0 = arith.constant 0 : index
    %c0_0 = arith.constant 0 : index
    %0 = vector.load %arg0[%c0, %c0_0] : memref<64x32xf32, #tpu.memory_space<vmem>>, vector<64x32xf32>
    %c0_1 = arith.constant 0 : index
    %c0_2 = arith.constant 0 : index
    %1 = vector.load %arg1[%c0_1, %c0_2] : memref<32x256xf32, #tpu.memory_space<vmem>>, vector<32x256xf32>
    %cst = arith.constant dense<0.000000e+00> : vector<64x256xf32>
    %2 = tpu.matmul %0, %1, %cst {dimension_numbers = #tpu.dot_dimension_numbers<[1], [0], [0], [1], [0, 0, 1, 1], [], []>} : vector<64x32xf32>, vector<32x256xf32>, vector<64x256xf32> -> vector<64x256xf32>
    %c0_3 = arith.constant 0 : index
    %c0_4 = arith.constant 0 : index
    %3 = vector.load %arg2[%c0_3, %c0_4] : memref<1x256xf32, #tpu.memory_space<vmem>>, vector<1x256xf32>
    %4 = vector.broadcast %3 : vector<1x256xf32> to vector<64x256xf32>
    %5 = arith.addf %2, %4 : vector<64x256xf32>
    %c0_5 = arith.constant 0 : index
    %c0_6 = arith.constant 0 : index
    %6 = vector.load %arg9[%c0_5, %c0_6] : memref<64x256xf32, #tpu.memory_space<vmem>>, vector<64x256xf32>
    tpu.vector_store %arg9[%c0_5, %c0_6], %5 {strides = array<i32>} : memref<64x256xf32, #tpu.memory_space<vmem>>, vector<64x256xf32>,
    %cst_7 = arith.constant 0.000000e+00 : f32
    %7 = vector.broadcast %cst_7 : f32 to vector<8x64xf32>
    %c0_i32 = arith.constant 0 : i32
    %c8_i32 = arith.constant 8 : i32
    %8 = arith.muli %c0_i32, %c8_i32 : i32
    %9 = tpu.assume_multiple %8, 8 : i32
    %10 = arith.index_cast %9 : i32 to index
    %c0_8 = arith.constant 0 : index
    %11 = vector.load %arg9[%10, %c0_8] : memref<64x256xf32, #tpu.memory_space<vmem>>, vector<8x256xf32>
    %c0_9 = arith.constant 0 : index
    %c0_10 = arith.constant 0 : index
    %12 = vector.load %arg3[%c0_9, %c0_10] : memref<64x256xf32, #tpu.memory_space<vmem>>, vector<64x256xf32>
    %cst_11 = arith.constant dense<0.000000e+00> : vector<8x256xf32>
    %13 = tpu.matmul %7, %12, %cst_11 {dimension_numbers = #tpu.dot_dimension_numbers<[1], [0], [0], [1], [0, 0, 1, 1], [], []>} : vector<8x64xf32>, vector<64x256xf32>, vector<8x256xf32> -> vector<8x256xf32>
    %14 = arith.addf %11, %13 : vector<8x256xf32>
    %15 = vector.extract_strided_slice %14 {offsets = [0, 0], sizes = [8, 64], strides = [1, 1]} : vector<8x256xf32> to vector<8x64xf32>
    %16 = arith.negf %15 : vector<8x64xf32>
    %17 = math.exp %16 : vector<8x64xf32>
    %cst_12 = arith.constant 1.000000e+00 : f32
    %18 = vector.broadcast %cst_12 : f32 to vector<8x64xf32>
    %19 = arith.addf %18, %17 : vector<8x64xf32>
    %20 = arith.divf %18, %19 : vector<8x64xf32>
    %21 = vector.extract_strided_slice %14 {offsets = [0, 64], sizes = [8, 64], strides = [1, 1]} : vector<8x256xf32> to vector<8x64xf32>
    %22 = arith.negf %21 : vector<8x64xf32>
    %23 = math.exp %22 : vector<8x64xf32>
    %cst_13 = arith.constant 1.000000e+00 : f32
    %24 = vector.broadcast %cst_13 : f32 to vector<8x64xf32>
    %25 = arith.addf %24, %23 : vector<8x64xf32>
    %26 = arith.divf %24, %25 : vector<8x64xf32>
    %27 = vector.extract_strided_slice %14 {offsets = [0, 128], sizes = [8, 64], strides = [1, 1]} : vector<8x256xf32> to vector<8x64xf32>
    %28 = math.tanh %27 : vector<8x64xf32>
    %29 = vector.extract_strided_slice %14 {offsets = [0, 192], sizes = [8, 64], strides = [1, 1]} : vector<8x256xf32> to vector<8x64xf32>
    %30 = arith.negf %29 : vector<8x64xf32>
    %31 = math.exp %30 : vector<8x64xf32>
    %cst_14 = arith.constant 1.000000e+00 : f32
    %32 = vector.broadcast %cst_14 : f32 to vector<8x64xf32>
    %33 = arith.addf %32, %31 : vector<8x64xf32>
    %34 = arith.divf %32, %33 : vector<8x64xf32>
    %35 = arith.mulf %26, %7 : vector<8x64xf32>
    %36 = arith.mulf %20, %28 : vector<8x64xf32>
    %37 = arith.addf %35, %36 : vector<8x64xf32>
    %38 = math.tanh %37 : vector<8x64xf32>
    %39 = arith.mulf %34, %38 : vector<8x64xf32>
    %c1_i32 = arith.constant 1 : i32
    %c8_i32_15 = arith.constant 8 : i32
    %40 = arith.muli %c1_i32, %c8_i32_15 : i32
    %41 = tpu.assume_multiple %40, 8 : i32
    %42 = arith.index_cast %41 : i32 to index
    %c0_16 = arith.constant 0 : index
    %43 = vector.load %arg9[%42, %c0_16] : memref<64x256xf32, #tpu.memory_space<vmem>>, vector<8x256xf32>
    %c0_17 = arith.constant 0 : index
    %c0_18 = arith.constant 0 : index
    %44 = vector.load %arg3[%c0_17, %c0_18] : memref<64x256xf32, #tpu.memory_space<vmem>>, vector<64x256xf32>
    %cst_19 = arith.constant dense<0.000000e+00> : vector<8x256xf32>
    %45 = tpu.matmul %39, %44, %cst_19 {dimension_numbers = #tpu.dot_dimension_numbers<[1], [0], [0], [1], [0, 0, 1, 1], [], []>} : vector<8x64xf32>, vector<64x256xf32>, vector<8x256xf32> -> vector<8x256xf32>
    %46 = arith.addf %43, %45 : vector<8x256xf32>
    %47 = vector.extract_strided_slice %46 {offsets = [0, 0], sizes = [8, 64], strides = [1, 1]} : vector<8x256xf32> to vector<8x64xf32>
    %48 = arith.negf %47 : vector<8x64xf32>
    %49 = math.exp %48 : vector<8x64xf32>
    %cst_20 = arith.constant 1.000000e+00 : f32
    %50 = vector.broadcast %cst_20 : f32 to vector<8x64xf32>
    %51 = arith.addf %50, %49 : vector<8x64xf32>
    %52 = arith.divf %50, %51 : vector<8x64xf32>
    %53 = vector.extract_strided_slice %46 {offsets = [0, 64], sizes = [8, 64], strides = [1, 1]} : vector<8x256xf32> to vector<8x64xf32>
    %54 = arith.negf %53 : vector<8x64xf32>
    %55 = math.exp %54 : vector<8x64xf32>
    %cst_21 = arith.constant 1.000000e+00 : f32
    %56 = vector.broadcast %cst_21 : f32 to vector<8x64xf32>
    %57 = arith.addf %56, %55 : vector<8x64xf32>
    %58 = arith.divf %56, %57 : vector<8x64xf32>
    %59 = vector.extract_strided_slice %46 {offsets = [0, 128], sizes = [8, 64], strides = [1, 1]} : vector<8x256xf32> to vector<8x64xf32>
    %60 = math.tanh %59 : vector<8x64xf32>
    %61 = vector.extract_strided_slice %46 {offsets = [0, 192], sizes = [8, 64], strides = [1, 1]} : vector<8x256xf32> to vector<8x64xf32>
    %62 = arith.negf %61 : vector<8x64xf32>
    %63 = math.exp %62 : vector<8x64xf32>
    %cst_22 = arith.constant 1.000000e+00 : f32
    %64 = vector.broadcast %cst_22 : f32 to vector<8x64xf32>
    %65 = arith.addf %64, %63 : vector<8x64xf32>
    %66 = arith.divf %64, %65 : vector<8x64xf32>
    %67 = arith.mulf %58, %37 : vector<8x64xf32>
    %68 = arith.mulf %52, %60 : vector<8x64xf32>
    %69 = arith.addf %67, %68 : vector<8x64xf32>
    %70 = math.tanh %69 : vector<8x64xf32>
    %71 = arith.mulf %66, %70 : vector<8x64xf32>
    %c2_i32 = arith.constant 2 : i32
    %c8_i32_23 = arith.constant 8 : i32
    %72 = arith.muli %c2_i32, %c8_i32_23 : i32
    %73 = tpu.assume_multiple %72, 8 : i32
    %74 = arith.index_cast %73 : i32 to index
    %c0_24 = arith.constant 0 : index
    %75 = vector.load %arg9[%74, %c0_24] : memref<64x256xf32, #tpu.memory_space<vmem>>, vector<8x256xf32>
    %c0_25 = arith.constant 0 : index
    %c0_26 = arith.constant 0 : index
    %76 = vector.load %arg3[%c0_25, %c0_26] : memref<64x256xf32, #tpu.memory_space<vmem>>, vector<64x256xf32>
    %cst_27 = arith.constant dense<0.000000e+00> : vector<8x256xf32>
    %77 = tpu.matmul %71, %76, %cst_27 {dimension_numbers = #tpu.dot_dimension_numbers<[1], [0], [0], [1], [0, 0, 1, 1], [], []>} : vector<8x64xf32>, vector<64x256xf32>, vector<8x256xf32> -> vector<8x256xf32>
    %78 = arith.addf %75, %77 : vector<8x256xf32>
    %79 = vector.extract_strided_slice %78 {offsets = [0, 0], sizes = [8, 64], strides = [1, 1]} : vector<8x256xf32> to vector<8x64xf32>
    %80 = arith.negf %79 : vector<8x64xf32>
    %81 = math.exp %80 : vector<8x64xf32>
    %cst_28 = arith.constant 1.000000e+00 : f32
    %82 = vector.broadcast %cst_28 : f32 to vector<8x64xf32>
    %83 = arith.addf %82, %81 : vector<8x64xf32>
    %84 = arith.divf %82, %83 : vector<8x64xf32>
    %85 = vector.extract_strided_slice %78 {offsets = [0, 64], sizes = [8, 64], strides = [1, 1]} : vector<8x256xf32> to vector<8x64xf32>
    %86 = arith.negf %85 : vector<8x64xf32>
    %87 = math.exp %86 : vector<8x64xf32>
    %cst_29 = arith.constant 1.000000e+00 : f32
    %88 = vector.broadcast %cst_29 : f32 to vector<8x64xf32>
    %89 = arith.addf %88, %87 : vector<8x64xf32>
    %90 = arith.divf %88, %89 : vector<8x64xf32>
    %91 = vector.extract_strided_slice %78 {offsets = [0, 128], sizes = [8, 64], strides = [1, 1]} : vector<8x256xf32> to vector<8x64xf32>
    %92 = math.tanh %91 : vector<8x64xf32>
    %93 = vector.extract_strided_slice %78 {offsets = [0, 192], sizes = [8, 64], strides = [1, 1]} : vector<8x256xf32> to vector<8x64xf32>
    %94 = arith.negf %93 : vector<8x64xf32>
    %95 = math.exp %94 : vector<8x64xf32>
    %cst_30 = arith.constant 1.000000e+00 : f32
    %96 = vector.broadcast %cst_30 : f32 to vector<8x64xf32>
    %97 = arith.addf %96, %95 : vector<8x64xf32>
    %98 = arith.divf %96, %97 : vector<8x64xf32>
    %99 = arith.mulf %90, %69 : vector<8x64xf32>
    %100 = arith.mulf %84, %92 : vector<8x64xf32>
    %101 = arith.addf %99, %100 : vector<8x64xf32>
    %102 = math.tanh %101 : vector<8x64xf32>
    %103 = arith.mulf %98, %102 : vector<8x64xf32>
    %c3_i32 = arith.constant 3 : i32
    %c8_i32_31 = arith.constant 8 : i32
    %104 = arith.muli %c3_i32, %c8_i32_31 : i32
    %105 = tpu.assume_multiple %104, 8 : i32
    %106 = arith.index_cast %105 : i32 to index
    %c0_32 = arith.constant 0 : index
    %107 = vector.load %arg9[%106, %c0_32] : memref<64x256xf32, #tpu.memory_space<vmem>>, vector<8x256xf32>
    %c0_33 = arith.constant 0 : index
    %c0_34 = arith.constant 0 : index
    %108 = vector.load %arg3[%c0_33, %c0_34] : memref<64x256xf32, #tpu.memory_space<vmem>>, vector<64x256xf32>
    %cst_35 = arith.constant dense<0.000000e+00> : vector<8x256xf32>
    %109 = tpu.matmul %103, %108, %cst_35 {dimension_numbers = #tpu.dot_dimension_numbers<[1], [0], [0], [1], [0, 0, 1, 1], [], []>} : vector<8x64xf32>, vector<64x256xf32>, vector<8x256xf32> -> vector<8x256xf32>
    %110 = arith.addf %107, %109 : vector<8x256xf32>
    %111 = vector.extract_strided_slice %110 {offsets = [0, 0], sizes = [8, 64], strides = [1, 1]} : vector<8x256xf32> to vector<8x64xf32>
    %112 = arith.negf %111 : vector<8x64xf32>
    %113 = math.exp %112 : vector<8x64xf32>
    %cst_36 = arith.constant 1.000000e+00 : f32
    %114 = vector.broadcast %cst_36 : f32 to vector<8x64xf32>
    %115 = arith.addf %114, %113 : vector<8x64xf32>
    %116 = arith.divf %114, %115 : vector<8x64xf32>
    %117 = vector.extract_strided_slice %110 {offsets = [0, 64], sizes = [8, 64], strides = [1, 1]} : vector<8x256xf32> to vector<8x64xf32>
    %118 = arith.negf %117 : vector<8x64xf32>
    %119 = math.exp %118 : vector<8x64xf32>
    %cst_37 = arith.constant 1.000000e+00 : f32
    %120 = vector.broadcast %cst_37 : f32 to vector<8x64xf32>
    %121 = arith.addf %120, %119 : vector<8x64xf32>
    %122 = arith.divf %120, %121 : vector<8x64xf32>
    %123 = vector.extract_strided_slice %110 {offsets = [0, 128], sizes = [8, 64], strides = [1, 1]} : vector<8x256xf32> to vector<8x64xf32>
    %124 = math.tanh %123 : vector<8x64xf32>
    %125 = vector.extract_strided_slice %110 {offsets = [0, 192], sizes = [8, 64], strides = [1, 1]} : vector<8x256xf32> to vector<8x64xf32>
    %126 = arith.negf %125 : vector<8x64xf32>
    %127 = math.exp %126 : vector<8x64xf32>
    %cst_38 = arith.constant 1.000000e+00 : f32
    %128 = vector.broadcast %cst_38 : f32 to vector<8x64xf32>
    %129 = arith.addf %128, %127 : vector<8x64xf32>
    %130 = arith.divf %128, %129 : vector<8x64xf32>
    %131 = arith.mulf %122, %101 : vector<8x64xf32>
    %132 = arith.mulf %116, %124 : vector<8x64xf32>
    %133 = arith.addf %131, %132 : vector<8x64xf32>
    %134 = math.tanh %133 : vector<8x64xf32>
    %135 = arith.mulf %130, %134 : vector<8x64xf32>
    %c4_i32 = arith.constant 4 : i32
    %c8_i32_39 = arith.constant 8 : i32
    %136 = arith.muli %c4_i32, %c8_i32_39 : i32
    %137 = tpu.assume_multiple %136, 8 : i32
    %138 = arith.index_cast %137 : i32 to index
    %c0_40 = arith.constant 0 : index
    %139 = vector.load %arg9[%138, %c0_40] : memref<64x256xf32, #tpu.memory_space<vmem>>, vector<8x256xf32>
    %c0_41 = arith.constant 0 : index
    %c0_42 = arith.constant 0 : index
    %140 = vector.load %arg3[%c0_41, %c0_42] : memref<64x256xf32, #tpu.memory_space<vmem>>, vector<64x256xf32>
    %cst_43 = arith.constant dense<0.000000e+00> : vector<8x256xf32>
    %141 = tpu.matmul %135, %140, %cst_43 {dimension_numbers = #tpu.dot_dimension_numbers<[1], [0], [0], [1], [0, 0, 1, 1], [], []>} : vector<8x64xf32>, vector<64x256xf32>, vector<8x256xf32> -> vector<8x256xf32>
    %142 = arith.addf %139, %141 : vector<8x256xf32>
    %143 = vector.extract_strided_slice %142 {offsets = [0, 0], sizes = [8, 64], strides = [1, 1]} : vector<8x256xf32> to vector<8x64xf32>
    %144 = arith.negf %143 : vector<8x64xf32>
    %145 = math.exp %144 : vector<8x64xf32>
    %cst_44 = arith.constant 1.000000e+00 : f32
    %146 = vector.broadcast %cst_44 : f32 to vector<8x64xf32>
    %147 = arith.addf %146, %145 : vector<8x64xf32>
    %148 = arith.divf %146, %147 : vector<8x64xf32>
    %149 = vector.extract_strided_slice %142 {offsets = [0, 64], sizes = [8, 64], strides = [1, 1]} : vector<8x256xf32> to vector<8x64xf32>
    %150 = arith.negf %149 : vector<8x64xf32>
    %151 = math.exp %150 : vector<8x64xf32>
    %cst_45 = arith.constant 1.000000e+00 : f32
    %152 = vector.broadcast %cst_45 : f32 to vector<8x64xf32>
    %153 = arith.addf %152, %151 : vector<8x64xf32>
    %154 = arith.divf %152, %153 : vector<8x64xf32>
    %155 = vector.extract_strided_slice %142 {offsets = [0, 128], sizes = [8, 64], strides = [1, 1]} : vector<8x256xf32> to vector<8x64xf32>
    %156 = math.tanh %155 : vector<8x64xf32>
    %157 = vector.extract_strided_slice %142 {offsets = [0, 192], sizes = [8, 64], strides = [1, 1]} : vector<8x256xf32> to vector<8x64xf32>
    %158 = arith.negf %157 : vector<8x64xf32>
    %159 = math.exp %158 : vector<8x64xf32>
    %cst_46 = arith.constant 1.000000e+00 : f32
    %160 = vector.broadcast %cst_46 : f32 to vector<8x64xf32>
    %161 = arith.addf %160, %159 : vector<8x64xf32>
    %162 = arith.divf %160, %161 : vector<8x64xf32>
    %163 = arith.mulf %154, %133 : vector<8x64xf32>
    %164 = arith.mulf %148, %156 : vector<8x64xf32>
    %165 = arith.addf %163, %164 : vector<8x64xf32>
    %166 = math.tanh %165 : vector<8x64xf32>
    %167 = arith.mulf %162, %166 : vector<8x64xf32>
    %c5_i32 = arith.constant 5 : i32
    %c8_i32_47 = arith.constant 8 : i32
    %168 = arith.muli %c5_i32, %c8_i32_47 : i32
    %169 = tpu.assume_multiple %168, 8 : i32
    %170 = arith.index_cast %169 : i32 to index
    %c0_48 = arith.constant 0 : index
    %171 = vector.load %arg9[%170, %c0_48] : memref<64x256xf32, #tpu.memory_space<vmem>>, vector<8x256xf32>
    %c0_49 = arith.constant 0 : index
    %c0_50 = arith.constant 0 : index
    %172 = vector.load %arg3[%c0_49, %c0_50] : memref<64x256xf32, #tpu.memory_space<vmem>>, vector<64x256xf32>
    %cst_51 = arith.constant dense<0.000000e+00> : vector<8x256xf32>
    %173 = tpu.matmul %167, %172, %cst_51 {dimension_numbers = #tpu.dot_dimension_numbers<[1], [0], [0], [1], [0, 0, 1, 1], [], []>} : vector<8x64xf32>, vector<64x256xf32>, vector<8x256xf32> -> vector<8x256xf32>
    %174 = arith.addf %171, %173 : vector<8x256xf32>
    %175 = vector.extract_strided_slice %174 {offsets = [0, 0], sizes = [8, 64], strides = [1, 1]} : vector<8x256xf32> to vector<8x64xf32>
    %176 = arith.negf %175 : vector<8x64xf32>
    %177 = math.exp %176 : vector<8x64xf32>
    %cst_52 = arith.constant 1.000000e+00 : f32
    %178 = vector.broadcast %cst_52 : f32 to vector<8x64xf32>
    %179 = arith.addf %178, %177 : vector<8x64xf32>
    %180 = arith.divf %178, %179 : vector<8x64xf32>
    %181 = vector.extract_strided_slice %174 {offsets = [0, 64], sizes = [8, 64], strides = [1, 1]} : vector<8x256xf32> to vector<8x64xf32>
    %182 = arith.negf %181 : vector<8x64xf32>
    %183 = math.exp %182 : vector<8x64xf32>
    %cst_53 = arith.constant 1.000000e+00 : f32
    %184 = vector.broadcast %cst_53 : f32 to vector<8x64xf32>
    %185 = arith.addf %184, %183 : vector<8x64xf32>
    %186 = arith.divf %184, %185 : vector<8x64xf32>
    %187 = vector.extract_strided_slice %174 {offsets = [0, 128], sizes = [8, 64], strides = [1, 1]} : vector<8x256xf32> to vector<8x64xf32>
    %188 = math.tanh %187 : vector<8x64xf32>
    %189 = vector.extract_strided_slice %174 {offsets = [0, 192], sizes = [8, 64], strides = [1, 1]} : vector<8x256xf32> to vector<8x64xf32>
    %190 = arith.negf %189 : vector<8x64xf32>
    %191 = math.exp %190 : vector<8x64xf32>
    %cst_54 = arith.constant 1.000000e+00 : f32
    %192 = vector.broadcast %cst_54 : f32 to vector<8x64xf32>
    %193 = arith.addf %192, %191 : vector<8x64xf32>
    %194 = arith.divf %192, %193 : vector<8x64xf32>
    %195 = arith.mulf %186, %165 : vector<8x64xf32>
    %196 = arith.mulf %180, %188 : vector<8x64xf32>
    %197 = arith.addf %195, %196 : vector<8x64xf32>
    %198 = math.tanh %197 : vector<8x64xf32>
    %199 = arith.mulf %194, %198 : vector<8x64xf32>
    %c6_i32 = arith.constant 6 : i32
    %c8_i32_55 = arith.constant 8 : i32
    %200 = arith.muli %c6_i32, %c8_i32_55 : i32
    %201 = tpu.assume_multiple %200, 8 : i32
    %202 = arith.index_cast %201 : i32 to index
    %c0_56 = arith.constant 0 : index
    %203 = vector.load %arg9[%202, %c0_56] : memref<64x256xf32, #tpu.memory_space<vmem>>, vector<8x256xf32>
    %c0_57 = arith.constant 0 : index
    %c0_58 = arith.constant 0 : index
    %204 = vector.load %arg3[%c0_57, %c0_58] : memref<64x256xf32, #tpu.memory_space<vmem>>, vector<64x256xf32>
    %cst_59 = arith.constant dense<0.000000e+00> : vector<8x256xf32>
    %205 = tpu.matmul %199, %204, %cst_59 {dimension_numbers = #tpu.dot_dimension_numbers<[1], [0], [0], [1], [0, 0, 1, 1], [], []>} : vector<8x64xf32>, vector<64x256xf32>, vector<8x256xf32> -> vector<8x256xf32>
    %206 = arith.addf %203, %205 : vector<8x256xf32>
    %207 = vector.extract_strided_slice %206 {offsets = [0, 0], sizes = [8, 64], strides = [1, 1]} : vector<8x256xf32> to vector<8x64xf32>
    %208 = arith.negf %207 : vector<8x64xf32>
    %209 = math.exp %208 : vector<8x64xf32>
    %cst_60 = arith.constant 1.000000e+00 : f32
    %210 = vector.broadcast %cst_60 : f32 to vector<8x64xf32>
    %211 = arith.addf %210, %209 : vector<8x64xf32>
    %212 = arith.divf %210, %211 : vector<8x64xf32>
    %213 = vector.extract_strided_slice %206 {offsets = [0, 64], sizes = [8, 64], strides = [1, 1]} : vector<8x256xf32> to vector<8x64xf32>
    %214 = arith.negf %213 : vector<8x64xf32>
    %215 = math.exp %214 : vector<8x64xf32>
    %cst_61 = arith.constant 1.000000e+00 : f32
    %216 = vector.broadcast %cst_61 : f32 to vector<8x64xf32>
    %217 = arith.addf %216, %215 : vector<8x64xf32>
    %218 = arith.divf %216, %217 : vector<8x64xf32>
    %219 = vector.extract_strided_slice %206 {offsets = [0, 128], sizes = [8, 64], strides = [1, 1]} : vector<8x256xf32> to vector<8x64xf32>
    %220 = math.tanh %219 : vector<8x64xf32>
    %221 = vector.extract_strided_slice %206 {offsets = [0, 192], sizes = [8, 64], strides = [1, 1]} : vector<8x256xf32> to vector<8x64xf32>
    %222 = arith.negf %221 : vector<8x64xf32>
    %223 = math.exp %222 : vector<8x64xf32>
    %cst_62 = arith.constant 1.000000e+00 : f32
    %224 = vector.broadcast %cst_62 : f32 to vector<8x64xf32>
    %225 = arith.addf %224, %223 : vector<8x64xf32>
    %226 = arith.divf %224, %225 : vector<8x64xf32>
    %227 = arith.mulf %218, %197 : vector<8x64xf32>
    %228 = arith.mulf %212, %220 : vector<8x64xf32>
    %229 = arith.addf %227, %228 : vector<8x64xf32>
    %230 = math.tanh %229 : vector<8x64xf32>
    %231 = arith.mulf %226, %230 : vector<8x64xf32>
    %c7_i32 = arith.constant 7 : i32
    %c8_i32_63 = arith.constant 8 : i32
    %232 = arith.muli %c7_i32, %c8_i32_63 : i32
    %233 = tpu.assume_multiple %232, 8 : i32
    %234 = arith.index_cast %233 : i32 to index
    %c0_64 = arith.constant 0 : index
    %235 = vector.load %arg9[%234, %c0_64] : memref<64x256xf32, #tpu.memory_space<vmem>>, vector<8x256xf32>
    %c0_65 = arith.constant 0 : index
    %c0_66 = arith.constant 0 : index
    %236 = vector.load %arg3[%c0_65, %c0_66] : memref<64x256xf32, #tpu.memory_space<vmem>>, vector<64x256xf32>
    %cst_67 = arith.constant dense<0.000000e+00> : vector<8x256xf32>
    %237 = tpu.matmul %231, %236, %cst_67 {dimension_numbers = #tpu.dot_dimension_numbers<[1], [0], [0], [1], [0, 0, 1, 1], [], []>} : vector<8x64xf32>, vector<64x256xf32>, vector<8x256xf32> -> vector<8x256xf32>
    %238 = arith.addf %235, %237 : vector<8x256xf32>
    %239 = vector.extract_strided_slice %238 {offsets = [0, 0], sizes = [8, 64], strides = [1, 1]} : vector<8x256xf32> to vector<8x64xf32>
    %240 = arith.negf %239 : vector<8x64xf32>
    %241 = math.exp %240 : vector<8x64xf32>
    %cst_68 = arith.constant 1.000000e+00 : f32
    %242 = vector.broadcast %cst_68 : f32 to vector<8x64xf32>
    %243 = arith.addf %242, %241 : vector<8x64xf32>
    %244 = arith.divf %242, %243 : vector<8x64xf32>
    %245 = vector.extract_strided_slice %238 {offsets = [0, 64], sizes = [8, 64], strides = [1, 1]} : vector<8x256xf32> to vector<8x64xf32>
    %246 = arith.negf %245 : vector<8x64xf32>
    %247 = math.exp %246 : vector<8x64xf32>
    %cst_69 = arith.constant 1.000000e+00 : f32
    %248 = vector.broadcast %cst_69 : f32 to vector<8x64xf32>
    %249 = arith.addf %248, %247 : vector<8x64xf32>
    %250 = arith.divf %248, %249 : vector<8x64xf32>
    %251 = vector.extract_strided_slice %238 {offsets = [0, 128], sizes = [8, 64], strides = [1, 1]} : vector<8x256xf32> to vector<8x64xf32>
    %252 = math.tanh %251 : vector<8x64xf32>
    %253 = vector.extract_strided_slice %238 {offsets = [0, 192], sizes = [8, 64], strides = [1, 1]} : vector<8x256xf32> to vector<8x64xf32>
    %254 = arith.negf %253 : vector<8x64xf32>
    %255 = math.exp %254 : vector<8x64xf32>
    %cst_70 = arith.constant 1.000000e+00 : f32
    %256 = vector.broadcast %cst_70 : f32 to vector<8x64xf32>
    %257 = arith.addf %256, %255 : vector<8x64xf32>
    %258 = arith.divf %256, %257 : vector<8x64xf32>
    %259 = arith.mulf %250, %229 : vector<8x64xf32>
    %260 = arith.mulf %244, %252 : vector<8x64xf32>
    %261 = arith.addf %259, %260 : vector<8x64xf32>
    %262 = math.tanh %261 : vector<8x64xf32>
    %263 = arith.mulf %258, %262 : vector<8x64xf32>
    %c8_i32_71 = arith.constant 8 : i32
    %c0_72 = arith.constant 0 : index
    %c0_73 = arith.constant 0 : index
    %264 = vector.load %arg4[%c0_72, %c0_73] : memref<64x32xf32, #tpu.memory_space<vmem>>, vector<64x32xf32>
    %cst_74 = arith.constant dense<0.000000e+00> : vector<8x32xf32>
    %265 = tpu.matmul %263, %264, %cst_74 {dimension_numbers = #tpu.dot_dimension_numbers<[1], [0], [0], [1], [0, 0, 1, 1], [], []>} : vector<8x64xf32>, vector<64x32xf32>, vector<8x32xf32> -> vector<8x32xf32>
    %c0_75 = arith.constant 0 : index
    %c0_76 = arith.constant 0 : index
    %266 = vector.load %arg5[%c0_75, %c0_76] : memref<1x32xf32, #tpu.memory_space<vmem>>, vector<1x32xf32>
    %267 = vector.broadcast %266 : vector<1x32xf32> to vector<8x32xf32>
    %268 = arith.addf %265, %267 : vector<8x32xf32>
    %cst_77 = arith.constant 0.000000e+00 : f32
    %269 = vector.broadcast %cst_77 : f32 to vector<8x32xf32>
    %270 = arith.maximumf %268, %269 : vector<8x32xf32>
    %c0_78 = arith.constant 0 : index
    %c0_79 = arith.constant 0 : index
    %271 = vector.load %arg6[%c0_78, %c0_79] : memref<32x16xf32, #tpu.memory_space<vmem>>, vector<32x16xf32>
    %cst_80 = arith.constant dense<0.000000e+00> : vector<8x16xf32>
    %272 = tpu.matmul %270, %271, %cst_80 {dimension_numbers = #tpu.dot_dimension_numbers<[1], [0], [0], [1], [0, 0, 1, 1], [], []>} : vector<8x32xf32>, vector<32x16xf32>, vector<8x16xf32> -> vector<8x16xf32>
    %c0_81 = arith.constant 0 : index
    %c0_82 = arith.constant 0 : index
    %273 = vector.load %arg7[%c0_81, %c0_82] : memref<1x16xf32, #tpu.memory_space<vmem>>, vector<1x16xf32>
    %274 = vector.broadcast %273 : vector<1x16xf32> to vector<8x16xf32>
    %275 = arith.addf %272, %274 : vector<8x16xf32>
    %cst_83 = arith.constant 0.000000e+00 : f32
    %276 = vector.broadcast %cst_83 : f32 to vector<8x16xf32>
    %277 = arith.maximumf %275, %276 : vector<8x16xf32>
    %c0_84 = arith.constant 0 : index
    %c0_85 = arith.constant 0 : index
    %278 = vector.load %arg8[%c0_84, %c0_85] : memref<8x16xf32, #tpu.memory_space<vmem>>, vector<8x16xf32>
    tpu.vector_store %arg8[%c0_84, %c0_85], %277 {strides = array<i32>} : memref<8x16xf32, #tpu.memory_space<vmem>>, vector<8x16xf32>,
    return
  }
}

</mosaic_0001>

<bundles_post_ra>
// kernel: tpu_custom_call.1
= control target key start
LH: loop header
LB: loop body
LE: loop exit
PB: predicated region body
PF: predicated region fallthrough
CT: control target
= control target key end

     0   :  { %v1656_v7 = vmov 0.0   ;;  %vm58_vm0 = vcmask 261120   ;;  %s2049_s0 = inlined_call_operand.vmem [shape: f32[64,32], index: 0, kind: input, shape index: {}]   ;;  %s2050_s1 = inlined_call_operand.vmem [shape: f32[32,256], index: 1, kind: input, shape index: {}]   ;;  %s2051_s2 = inlined_call_operand.vmem [shape: f32[1,256], index: 2, kind: input, shape index: {}]   ;;  %s2052_s3 = inlined_call_operand.vmem [shape: f32[64,256], index: 3, kind: input, shape index: {}]   ;;  %s2053_s4 = inlined_call_operand.vmem [shape: f32[64,32], index: 4, kind: input, shape index: {}]   ;;  %s2054_s5 = inlined_call_operand.vmem [shape: f32[1,32], index: 5, kind: input, shape index: {}]   ;;  %s2055_s6 = inlined_call_operand.vmem [shape: f32[32,16], index: 6, kind: input, shape index: {}]   ;;  %s2056_s7 = inlined_call_operand.vmem [shape: f32[1,16], index: 7, kind: input, shape index: {}]   ;;  %s2057_s8 = inlined_call_operand.hbm [shape: f32[8,16], index: 8, kind: output, shape index: {}]  }
   0x1   :  { %v39_v0 = vld [vmem:[%s2050_s1 + $0x8] sm:$0xff]  ;;  %v41_v1 = vld [vmem:[%s2050_s1 + $0x18] sm:$0xff]  ;;  %v38_v2 = vld [vmem:[%s2050_s1] sm:$0xff]  ;;  %147 = vmatprep.mubr.f32.mxu1 %v1656_v7  ;;  %511 = vmatprep.mubr.f32.mxu0 %v1656_v7 }
   0x2   :  { %v1345_v3 = vpack.c.bf16 %v41_v1, %v39_v0  ;;  %v40_v4 = vld [vmem:[%s2050_s1 + $0x10] sm:$0xff]  ;;  %v43_v5 = vld [vmem:[%s2050_s1 + $0x28] sm:$0xff]  ;;  %v45_v6 = vld [vmem:[%s2050_s1 + $0x38] sm:$0xff] }
   0x3   :  { %v1347_v8 = vpack.c.bf16 %v40_v4, %v38_v2  ;;  %v1349_v9 = vpack.c.bf16 %v45_v6, %v43_v5  ;;  %v42_v10 = vld [vmem:[%s2050_s1 + $0x20] sm:$0xff]  ;;  %v44_v11 = vld [vmem:[%s2050_s1 + $0x30] sm:$0xff]  ;;  %v218_v12 = vld [vmem:[%s2052_s3 + $0x8] sm:$0xff] }
   0x4   :  { %1346 = vmatprep.subr.bf16.mxu1 %v1345_v3  ;;  %v220_v13 = vld [vmem:[%s2052_s3 + $0x18] sm:$0xff]  ;;  %v217_v14 = vld [vmem:[%s2052_s3] sm:$0xff]  ;;  %v1351_v15 = vpack.c.bf16 %v44_v11, %v42_v10  ;;  %v219_v17 = vld [vmem:[%s2052_s3 + $0x10] sm:$0xff] }
   0x5   :  { %1348 = vmatpush1.bf16.msra.mxu1 %v1347_v8  ;;  %v1741_v16 = vpack.c.bf16 %v220_v13, %v218_v12  ;;  %v1746_v18 = vpack.c.bf16 %v219_v17, %v217_v14  ;;  %v222_v19 = vld [vmem:[%s2052_s3 + $0x28] sm:$0xff]  ;;  %v224_v20 = vld [vmem:[%s2052_s3 + $0x38] sm:$0xff]  ;;  %v221_v22 = vld [vmem:[%s2052_s3 + $0x20] sm:$0xff] }
   0x6   :  { %1350 = vmatprep.subr.bf16.mxu1 %v1349_v9  ;;  %v1754_v21 = vpack.c.bf16 %v224_v20, %v222_v19  ;;  %v223_v23 = vld [vmem:[%s2052_s3 + $0x30] sm:$0xff]  ;;  %v30_v24 = vld [vmem:[%s2049_s0] sm:$0xff]  ;;  %v226_v25 = vld [vmem:[%s2052_s3 + $0x48] sm:$0xff] }
   0x7   :  { %1386 = vmatprep.subr.bf16.mxu0 %v1741_v16  ;;  %v228_v26 = vld [vmem:[%s2052_s3 + $0x58] sm:$0xff]  ;;  %v1775_v27 = vpack.c.bf16 %v223_v23, %v221_v22  ;;  %v225_v28 = vld [vmem:[%s2052_s3 + $0x40] sm:$0xff]  ;;  %v227_v29 = vld [vmem:[%s2052_s3 + $0x50] sm:$0xff] }
   0x8   :  { %1388 = vmatpush1.bf16.msra.mxu0 %v1746_v18  ;;  %v1784_v30 = vpack.c.bf16 %v228_v26, %v226_v25 }
   0x9   :  { %1352 = vmatpush1.bf16.msra.mxu1 %v1351_v15  ;;  %1390 = vmatprep.subr.bf16.mxu0 %v1754_v21 }
   0xa   :  { %1354 = vmatprep.subr.bf16.mxu1 %v1741_v16 }
   0xc   :  { %1266 = vmatmul.mubr.msk.f32.vlgmr.msra.gmra.mrb[0].mxu1 %vm58_vm0, %v30_v24  ;;  %1392 = vmatpush1.bf16.msra.mxu0 %v1775_v27 }
   0xd   :  { %13 = vsyncpa [#allocation4], 0  ;;  %1356 = vmatpush1.bf16.msra.mxu1 %v1746_v18  ;;  %153 = vmatprep.mubr.f32.mxu1 %v1656_v7  ;;  %v31_v31 = vld [vmem:[%s2049_s0 + $0x8] sm:$0xff]  ;;  %v232_v33 = vld [vmem:[%s2052_s3 + $0x78] sm:$0xff]  ;;  %v1799_v34 = vpack.c.bf16 %v227_v29, %v225_v28  ;;  %v48_v51 = vlaneseq  ;;  %vm233_vm1 = vcmask 523264   ;;  %vm1659_vm2 = vmmov 0  }
   0xe   :  { %v230_v32 = vld [vmem:[%s2052_s3 + $0x68] sm:$0xff]  ;;  %1358 = vmatprep.subr.bf16.mxu1 %v1754_v21  ;;  %1394 = vmatprep.subr.bf16.mxu0 %v1784_v30  ;;  %v229_v35 = vld [vmem:[%s2052_s3 + $0x60] sm:$0xff]  ;;  %v231_v36 = vld [vmem:[%s2052_s3 + $0x70] sm:$0xff]  ;;  %s1660_s24 = smov [#allocation3]   ;;  %vm1243_vm3 = vcmask 130048  }
   0xf   :  { %v1809_v37 = vpack.c.bf16 %v232_v33, %v230_v32  ;;  %v32_v38 = vld [vmem:[%s2049_s0 + $0x10] sm:$0xff]  ;;  %v1818_v39 = vpack.c.bf16 %v231_v36, %v229_v35  ;;  %v33_v40 = vld [vmem:[%s2049_s0 + $0x18] sm:$0xff]  ;;  %v34_v41 = vld [vmem:[%s2049_s0 + $0x20] sm:$0xff]  ;;  %v49_v54 = vshrl.u32 %v48_v51, 7  ;;  %s1251_s25 = sshll.u32 %s1660_s24, 4  ;;  %s1252_s25 = int_to_ptr.vmem [resolvable:$true] %s1251_s25 }
  0x10   :  { %1267 = vmatmul.mubr.msk.f32.gmra.mrb[2].mxu1 %vm58_vm0, %v31_v31  ;;  %1396 = vmatpush1.bf16.msra.mxu0 %v1799_v34  ;;  %v35_v42 = vld [vmem:[%s2049_s0 + $0x28] sm:$0xff]  ;;  %v36_v43 = vld [vmem:[%s2049_s0 + $0x30] sm:$0xff]  ;;  %v37_v44 = vld [vmem:[%s2049_s0 + $0x38] sm:$0xff]  ;;  %p1637_p1 = scmp.lt.s32.totalorder %s1252_s25, %s1252_s25 }
  0x11   :  { %159 = vmatprep.mubr.f32.mxu1 %v1656_v7  ;;  %1360 = vmatpush1.bf16.msra.mxu1 %v1775_v27  ;;  %v50_v57 = vsub.s32 0, %v49_v54  ;;  %v46_v58 = vld [vmem:[%s2051_s2] sm:$0x3]  ;;  %v54_v2 = vsub.s32 1, %v49_v54  ;;  %s1657_s2 = smov 64  }
  0x12   :  { %1362 = vmatprep.subr.bf16.mxu1 %v1784_v30  ;;  %1398 = vmatprep.subr.bf16.mxu0 %v1809_v37 }
  0x13   :  { %v1890_v61 = vrot.slane %v46_v58, %v50_v57  ;;  %v1893_v3 = vrot.slane %v46_v58, %v54_v2 }
  0x14   :  { %1268 = vmatmul.mubr.msk.f32.gmra.mrb[4].mxu1 %vm58_vm0, %v32_v38  ;;  %1400 = vmatpush1.bf16.msra.mxu0 %v1818_v39 }
  0x15   :  { %165 = vmatprep.mubr.f32.mxu1 %v1656_v7  ;;  %1364 = vmatpush1.bf16.msra.mxu1 %v1799_v34 }
  0x16   :  { %1366 = vmatprep.subr.bf16.mxu1 %v1809_v37  ;;  %1402 = vmatprep.subr.bf16.mxu0 %v1741_v16 }
  0x18   :  { %1269 = vmatmul.mubr.msk.f32.gmra.mrb[6].mxu1 %vm58_vm0, %v33_v40 }
  0x19   :  { %171 = vmatprep.mubr.f32.mxu1 %v1656_v7  ;;  %1368 = vmatpush1.bf16.msra.mxu1 %v1818_v39 }
  0x1a   :  { %1370 = vmatprep.subr.bf16.mxu1 %v1741_v16 }
  0x1c   :  { %1270 = vmatmul.mubr.msk.f32.gmra.mrb[8].mxu1 %vm58_vm0, %v34_v41 }
  0x1d   :  { %177 = vmatprep.mubr.f32.mxu1 %v1656_v7 }
  0x20   :  { %1271 = vmatmul.mubr.msk.f32.gmra.mrb[10].mxu1 %vm58_vm0, %v35_v42 }
  0x21   :  { %183 = vmatprep.mubr.f32.mxu1 %v1656_v7 }
  0x24   :  { %1272 = vmatmul.mubr.msk.f32.gmra.mrb[12].mxu1 %vm58_vm0, %v36_v43 }
  0x25   :  { %189 = vmatprep.mubr.f32.mxu1 %v1656_v7 }
  0x28   :  { %1273 = vmatmul.mubr.msk.f32.gmra.mrb[14].mxu1 %vm58_vm0, %v37_v44 }
  0x29   :  { %301 = vmatprep.mubr.f32.mxu1 %v1656_v7 }
  0x2c   :  { %302 = vmatmul.mubr.f32.vlgmr.msra.gmra.mrb[0].mxu1 %v1656_v7 }
  0x2d   :  { %1372 = vmatpush1.bf16.msra.mxu1 %v1746_v18  ;;  %406 = vmatprep.mubr.f32.mxu1 %v1656_v7 }
  0x2e   :  { %1374 = vmatprep.subr.bf16.mxu1 %v1754_v21 }
  0x31   :  { %1376 = vmatpush1.bf16.msra.mxu1 %v1775_v27 }
  0x32   :  { %1378 = vmatprep.subr.bf16.mxu1 %v1784_v30 }
  0x35   :  { %1380 = vmatpush1.bf16.msra.mxu1 %v1799_v34 }
  0x36   :  { %1382 = vmatprep.subr.bf16.mxu1 %v1809_v37 }
  0x39   :  { %1384 = vmatpush1.bf16.msra.mxu1 %v1818_v39 }
  0xe7   :  { %v1863_v45 = vpop.f32.mrb[4].mxu1 }
  0xe8   :  { %v1865_v46 = vpop.f32.mrb[5].mxu1 }
  0xeb   :  { %v1867_v47 = vpop.f32.mrb[6].mxu1 }
  0xec   :  { %v1869_v48 = vpop.f32.mrb[7].mxu1 }
  0xef   :  { %v1871_v49 = vpop.f32.mrb[8].mxu1 }
  0xf0   :  { %v1873_v50 = vpop.f32.mrb[9].mxu1 }
  0xf3   :  { %v1875_v52 = vpop.f32.mrb[10].mxu1 }
  0xf4   :  { %v1877_v53 = vpop.f32.mrb[11].mxu1 }
  0xf7   :  { %v1879_v55 = vpop.f32.mrb[12].mxu1 }
  0xf8   :  { %v1881_v56 = vpop.f32.mrb[13].mxu1 }
  0xfb   :  { %v1886_v59 = vpop.f32.mrb[14].mxu1 }
  0xfc   :  { %v1888_v60 = vpop.f32.mrb[15].mxu1 }
  0xff   :  { %v303_v62 = vpop.f32.mrb[0].mxu1 }
 0x100   :  { %v1499_v63 = vadd.f32 %v303_v62, %v1890_v61  ;;  %v305_v0 = vpop.f32.mrb[1].mxu1  ;;  %v162_v62 = vadd.f32 %v1863_v45, %v1890_v61 }
 0x101   :  { %v1500_v4 = vadd.f32 %v305_v0, %v1893_v3 }
 0x102   :  { %v1274_v1 = vmul.f32 -1.442695, %v1499_v63  ;;  %v164_v63 = vadd.f32 %v1865_v46, %v1893_v3 }
 0x103   :  { %v1275_v11 = vmul.f32 -1.442695, %v1500_v4 }
 0x104   :  { %1536 = vpow2.f32 %v1274_v1 }
 0x105   :  { %1538 = vtanh.f32 %v1500_v4 }
 0x10e   :  { %v1537_v5 = vpop.eup %1536 }
 0x10f   :  { %v313_v6 = vadd.f32 1.0, %v1537_v5  ;;  %v1539_v8 = vpop.eup %1538 }
 0x111   :  { %1540 = vrcp.f32 %v313_v6 }
 0x112   :  { %1542 = vpow2.f32 %v1275_v11 }
 0x11b   :  { %v1541_v9 = vpop.eup %1540 }
 0x11c   :  { %v324_v10 = vmul.f32 %v1541_v9, %v1539_v8  ;;  %v1543_v12 = vpop.eup %1542  ;;  %v323_v14 = vmul.f32 0.0, %v1541_v9 }
 0x11d   :  { %v320_v13 = vadd.f32 1.0, %v1543_v12 }
 0x11e   :  { %326 = vrot.lane.b32.xlu0 %v324_v10, %s1657_s2 }
 0x11f   :  { %1544 = vrcp.f32 %v320_v13 }
 0x129   :  { %v1545_v19 = vpop.eup %1544 }
 0x190   :  { %v327_v15 = vpop.permute.xlu0 %326 }
 0x191   :  { %v329_v17 = vadd.f32 %v327_v15, %v323_v14 }
 0x193   :  { %1546 = vtanh.f32 %v329_v17 }
 0x19d   :  { %v1547_v20 = vpop.eup %1546 }
 0x19e   :  { %v331_v22 = vmul.f32 %v1547_v20, %v1545_v19 }
 0x1a0   :  { %338 = vrot.lane.b32.xlu0 %v331_v22, %s1657_s2 }
 0x212   :  { %v339_v23 = vpop.permute.xlu0 %338 }
 0x213   :  { %1276 = vmatmul.mubr.msk.f32.vlgmr.msra.gmra.mrb[2].mxu1 %vm233_vm1, %v339_v23  ;;  %v168_v23 = vadd.f32 %v1867_v47, %v1890_v61 }
 0x214   :  { %1331 = vmatprep.mubr.msk.f32.mxu1 %vm1659_vm2, %v1656_v7 }
 0x2e6   :  { %v408_v24 = vpop.f32.mrb[2].mxu1 }
 0x2e7   :  { %v1501_v25 = vadd.f32 %v408_v24, %v1890_v61  ;;  %v410_v26 = vpop.f32.mrb[3].mxu1  ;;  %v170_v24 = vadd.f32 %v1869_v48, %v1893_v3 }
 0x2e8   :  { %v1502_v29 = vadd.f32 %v410_v26, %v1893_v3 }
 0x2e9   :  { %v1277_v28 = vmul.f32 -1.442695, %v1501_v25 }
 0x2ea   :  { %v1278_v38 = vmul.f32 -1.442695, %v1502_v29 }
 0x2eb   :  { %1548 = vpow2.f32 %v1277_v28 }
 0x2ec   :  { %1550 = vtanh.f32 %v1502_v29 }
 0x2f5   :  { %v1549_v31 = vpop.eup %1548 }
 0x2f6   :  { %v418_v32 = vadd.f32 1.0, %v1549_v31  ;;  %v1551_v33 = vpop.eup %1550 }
 0x2f8   :  { %1552 = vrcp.f32 %v418_v32 }
 0x2f9   :  { %1554 = vpow2.f32 %v1278_v38 }
 0x302   :  { %v1553_v35 = vpop.eup %1552 }
 0x303   :  { %v429_v36 = vmul.f32 %v1553_v35, %v1551_v33  ;;  %v1555_v40 = vpop.eup %1554  ;;  %v428_v42 = vmul.f32 %v1553_v35, %v329_v17 }
 0x304   :  { %v425_v41 = vadd.f32 1.0, %v1555_v40 }
 0x305   :  { %431 = vrot.lane.b32.xlu1 %v429_v36, %s1657_s2 }
 0x306   :  { %1556 = vrcp.f32 %v425_v41 }
 0x310   :  { %v1557_v51 = vpop.eup %1556 }
 0x377   :  { %v432_v43 = vpop.permute.xlu1 %431 }
 0x378   :  { %v434_v44 = vadd.f32 %v432_v43, %v428_v42 }
 0x37a   :  { %1558 = vtanh.f32 %v434_v44 }
 0x384   :  { %v1559_v54 = vpop.eup %1558 }
 0x385   :  { %v436_v57 = vmul.f32 %v1559_v54, %v1557_v51 }
 0x387   :  { %443 = vrot.lane.b32.xlu1 %v436_v57, %s1657_s2 }
 0x3f9   :  { %v444_v58 = vpop.permute.xlu1 %443 }
 0x3fa   :  { %1279 = vmatmul.mubr.msk.f32.vlgmr.msra.gmra.mrb[0].mxu0 %vm233_vm1, %v444_v58  ;;  %v174_v58 = vadd.f32 %v1871_v49, %v1890_v61 }
 0x3fb   :  { %1404 = vmatpush1.bf16.msra.mxu0 %v1746_v18  ;;  %616 = vmatprep.mubr.f32.mxu0 %v1656_v7 }
 0x3fc   :  { %1406 = vmatprep.subr.bf16.mxu0 %v1754_v21 }
 0x3ff   :  { %1408 = vmatpush1.bf16.msra.mxu0 %v1775_v27 }
 0x400   :  { %1410 = vmatprep.subr.bf16.mxu0 %v1784_v30 }
 0x403   :  { %1412 = vmatpush1.bf16.msra.mxu0 %v1799_v34 }
 0x404   :  { %1414 = vmatprep.subr.bf16.mxu0 %v1809_v37 }
 0x407   :  { %1416 = vmatpush1.bf16.msra.mxu0 %v1818_v39 }
 0x408   :  { %1418 = vmatprep.subr.bf16.mxu0 %v1741_v16 }
 0x4cd   :  { %v513_v0 = vpop.f32.mrb[0].mxu0 }
 0x4ce   :  { %v518_v1 = vadd.f32 %v513_v0, %v162_v62  ;;  %v515_v2 = vpop.f32.mrb[1].mxu0  ;;  %v176_v62 = vadd.f32 %v1873_v50, %v1893_v3 }
 0x4cf   :  { %v519_v4 = vadd.f32 %v515_v2, %v164_v63 }
 0x4d0   :  { %v1280_v5 = vmul.f32 -1.442695, %v518_v1 }
 0x4d1   :  { %v1281_v12 = vmul.f32 -1.442695, %v519_v4 }
 0x4d2   :  { %1560 = vpow2.f32 %v1280_v5 }
 0x4d3   :  { %1562 = vtanh.f32 %v519_v4 }
 0x4dc   :  { %v1561_v6 = vpop.eup %1560 }
 0x4dd   :  { %v523_v8 = vadd.f32 1.0, %v1561_v6  ;;  %v1563_v9 = vpop.eup %1562 }
 0x4df   :  { %1564 = vrcp.f32 %v523_v8 }
 0x4e0   :  { %1566 = vpow2.f32 %v1281_v12 }
 0x4e9   :  { %v1565_v10 = vpop.eup %1564 }
 0x4ea   :  { %v534_v11 = vmul.f32 %v1565_v10, %v1563_v9  ;;  %v1567_v45 = vpop.eup %1566  ;;  %v533_v46 = vmul.f32 %v1565_v10, %v434_v44 }
 0x4eb   :  { %v530_v13 = vadd.f32 1.0, %v1567_v45 }
 0x4ec   :  { %536 = vrot.lane.b32.xlu0 %v534_v11, %s1657_s2 }
 0x4ed   :  { %1568 = vrcp.f32 %v530_v13 }
 0x4f7   :  { %v1569_v17 = vpop.eup %1568 }
 0x55e   :  { %v537_v14 = vpop.permute.xlu0 %536 }
 0x55f   :  { %v539_v15 = vadd.f32 %v537_v14, %v533_v46 }
 0x561   :  { %1570 = vtanh.f32 %v539_v15 }
 0x56b   :  { %v1571_v19 = vpop.eup %1570 }
 0x56c   :  { %v541_v20 = vmul.f32 %v1571_v19, %v1569_v17  ;;  %v180_v19 = vadd.f32 %v1875_v52, %v1890_v61 }
 0x56e   :  { %548 = vrot.lane.b32.xlu1 %v541_v20, %s1657_s2  ;;  %v182_v20 = vadd.f32 %v1877_v53, %v1893_v3 }
 0x5e0   :  { %v549_v22 = vpop.permute.xlu1 %548 }
 0x5e1   :  { %1282 = vmatmul.mubr.msk.f32.vlgmr.msra.gmra.mrb[2].mxu0 %vm233_vm1, %v549_v22 }
 0x5e2   :  { %1420 = vmatpush1.bf16.msra.mxu0 %v1746_v18  ;;  %721 = vmatprep.mubr.f32.mxu0 %v1656_v7 }
 0x5e3   :  { %1422 = vmatprep.subr.bf16.mxu0 %v1754_v21 }
 0x5e6   :  { %1424 = vmatpush1.bf16.msra.mxu0 %v1775_v27 }
 0x5e7   :  { %1426 = vmatprep.subr.bf16.mxu0 %v1784_v30 }
 0x5ea   :  { %1428 = vmatpush1.bf16.msra.mxu0 %v1799_v34 }
 0x5eb   :  { %1430 = vmatprep.subr.bf16.mxu0 %v1809_v37 }
 0x5ee   :  { %1432 = vmatpush1.bf16.msra.mxu0 %v1818_v39 }
 0x5ef   :  { %1434 = vmatprep.subr.bf16.mxu0 %v1741_v16 }
 0x6b4   :  { %v618_v25 = vpop.f32.mrb[2].mxu0 }
 0x6b5   :  { %v623_v26 = vadd.f32 %v618_v25, %v168_v23  ;;  %v620_v28 = vpop.f32.mrb[3].mxu0 }
 0x6b6   :  { %v624_v29 = vadd.f32 %v620_v28, %v170_v24 }
 0x6b7   :  { %v1283_v31 = vmul.f32 -1.442695, %v623_v26 }
 0x6b8   :  { %v1284_v40 = vmul.f32 -1.442695, %v624_v29 }
 0x6b9   :  { %1572 = vpow2.f32 %v1283_v31 }
 0x6ba   :  { %1574 = vtanh.f32 %v624_v29 }
 0x6c3   :  { %v1573_v32 = vpop.eup %1572 }
 0x6c4   :  { %v628_v33 = vadd.f32 1.0, %v1573_v32  ;;  %v1575_v35 = vpop.eup %1574 }
 0x6c6   :  { %1576 = vrcp.f32 %v628_v33 }
 0x6c7   :  { %1578 = vpow2.f32 %v1284_v40 }
 0x6d0   :  { %v1577_v36 = vpop.eup %1576 }
 0x6d1   :  { %v639_v38 = vmul.f32 %v1577_v36, %v1575_v35  ;;  %v1579_v47 = vpop.eup %1578  ;;  %v638_v48 = vmul.f32 %v1577_v36, %v539_v15 }
 0x6d2   :  { %v635_v41 = vadd.f32 1.0, %v1579_v47 }
 0x6d3   :  { %641 = vrot.lane.b32.xlu0 %v639_v38, %s1657_s2 }
 0x6d4   :  { %1580 = vrcp.f32 %v635_v41 }
 0x6de   :  { %v1581_v44 = vpop.eup %1580 }
 0x745   :  { %v642_v42 = vpop.permute.xlu0 %641 }
 0x746   :  { %v644_v43 = vadd.f32 %v642_v42, %v638_v48  ;;  %v186_v42 = vadd.f32 %v1879_v55, %v1890_v61 }
 0x748   :  { %1582 = vtanh.f32 %v644_v43 }
 0x752   :  { %v1583_v51 = vpop.eup %1582 }
 0x753   :  { %v646_v54 = vmul.f32 %v1583_v51, %v1581_v44 }
 0x755   :  { %653 = vrot.lane.b32.xlu1 %v646_v54, %s1657_s2 }
 0x7c7   :  { %v654_v57 = vpop.permute.xlu1 %653 }
 0x7c8   :  { %1285 = vmatmul.mubr.msk.f32.vlgmr.msra.gmra.mrb[4].mxu0 %vm233_vm1, %v654_v57 }
 0x7c9   :  { %1436 = vmatpush1.bf16.msra.mxu0 %v1746_v18  ;;  %826 = vmatprep.mubr.f32.mxu0 %v1656_v7 }
 0x7ca   :  { %1438 = vmatprep.subr.bf16.mxu0 %v1754_v21 }
 0x7cd   :  { %1440 = vmatpush1.bf16.msra.mxu0 %v1775_v27 }
 0x7ce   :  { %1442 = vmatprep.subr.bf16.mxu0 %v1784_v30 }
 0x7d1   :  { %1444 = vmatpush1.bf16.msra.mxu0 %v1799_v34 }
 0x7d2   :  { %1446 = vmatprep.subr.bf16.mxu0 %v1809_v37 }
 0x7d5   :  { %1448 = vmatpush1.bf16.msra.mxu0 %v1818_v39 }
 0x7d6   :  { %1450 = vmatprep.subr.bf16.mxu0 %v1741_v16 }
 0x89b   :  { %v723_v63 = vpop.f32.mrb[4].mxu0 }
 0x89c   :  { %v728_v0 = vadd.f32 %v723_v63, %v174_v58  ;;  %v725_v1 = vpop.f32.mrb[5].mxu0 }
 0x89d   :  { %v729_v2 = vadd.f32 %v725_v1, %v176_v62 }
 0x89e   :  { %v1286_v4 = vmul.f32 -1.442695, %v728_v0 }
 0x89f   :  { %v1287_v11 = vmul.f32 -1.442695, %v729_v2 }
 0x8a0   :  { %1584 = vpow2.f32 %v1286_v4 }
 0x8a1   :  { %1586 = vtanh.f32 %v729_v2 }
 0x8aa   :  { %v1585_v5 = vpop.eup %1584 }
 0x8ab   :  { %v733_v6 = vadd.f32 1.0, %v1585_v5  ;;  %v1587_v8 = vpop.eup %1586  ;;  %v192_v5 = vadd.f32 %v1886_v59, %v1890_v61  ;;  %v1067_v59 = vld [vmem:[%s2053_s4] sm:$0xff]  ;;  %v1069_v61 = vld [vmem:[%s2053_s4 + $0x10] sm:$0xff] }
 0x8ad   :  { %1588 = vrcp.f32 %v733_v6  ;;  %v194_v6 = vadd.f32 %v1888_v60, %v1893_v3  ;;  %v1068_v60 = vld [vmem:[%s2053_s4 + $0x8] sm:$0xff] }
 0x8ae   :  { %1590 = vpow2.f32 %v1287_v11 }
 0x8b7   :  { %v1589_v9 = vpop.eup %1588 }
 0x8b8   :  { %v744_v10 = vmul.f32 %v1589_v9, %v1587_v8  ;;  %v1591_v49 = vpop.eup %1590  ;;  %v743_v50 = vmul.f32 %v1589_v9, %v644_v43 }
 0x8b9   :  { %v740_v12 = vadd.f32 1.0, %v1591_v49 }
 0x8ba   :  { %746 = vrot.lane.b32.xlu0 %v744_v10, %s1657_s2 }
 0x8bb   :  { %1592 = vrcp.f32 %v740_v12 }
 0x8c5   :  { %v1593_v46 = vpop.eup %1592 }
 0x92c   :  { %v747_v45 = vpop.permute.xlu0 %746 }
 0x92d   :  { %v749_v13 = vadd.f32 %v747_v45, %v743_v50 }
 0x92f   :  { %1594 = vtanh.f32 %v749_v13 }
 0x939   :  { %v1595_v14 = vpop.eup %1594 }
 0x93a   :  { %v751_v15 = vmul.f32 %v1595_v14, %v1593_v46  ;;  %v1482_v14 = vpack.c.bf16 %v1068_v60, %v1067_v59 }
 0x93c   :  { %758 = vrot.lane.b32.xlu1 %v751_v15, %s1657_s2  ;;  %v1070_v15 = vld [vmem:[%s2053_s4 + $0x18] sm:$0xff] }
 0x9ae   :  { %v759_v17 = vpop.permute.xlu1 %758 }
 0x9af   :  { %1288 = vmatmul.mubr.msk.f32.vlgmr.msra.gmra.mrb[6].mxu0 %vm233_vm1, %v759_v17  ;;  %v1485_v17 = vpack.c.bf16 %v1070_v15, %v1069_v61 }
 0x9b0   :  { %1452 = vmatpush1.bf16.msra.mxu0 %v1746_v18  ;;  %931 = vmatprep.mubr.f32.mxu0 %v1656_v7 }
 0x9b1   :  { %1454 = vmatprep.subr.bf16.mxu0 %v1754_v21 }
 0x9b4   :  { %1456 = vmatpush1.bf16.msra.mxu0 %v1775_v27 }
 0x9b5   :  { %1458 = vmatprep.subr.bf16.mxu0 %v1784_v30 }
 0x9b8   :  { %1460 = vmatpush1.bf16.msra.mxu0 %v1799_v34 }
 0x9b9   :  { %1462 = vmatprep.subr.bf16.mxu0 %v1809_v37 }
 0x9bc   :  { %1464 = vmatpush1.bf16.msra.mxu0 %v1818_v39 }
 0x9bd   :  { %1466 = vmatprep.subr.bf16.mxu0 %v1741_v16 }
 0xa82   :  { %v828_v22 = vpop.f32.mrb[6].mxu0 }
 0xa83   :  { %v833_v23 = vadd.f32 %v828_v22, %v180_v19  ;;  %v830_v24 = vpop.f32.mrb[7].mxu0  ;;  %v1071_v19 = vld [vmem:[%s2053_s4 + $0x20] sm:$0xff] }
 0xa84   :  { %v834_v25 = vadd.f32 %v830_v24, %v182_v20  ;;  %v1072_v20 = vld [vmem:[%s2053_s4 + $0x28] sm:$0xff]  ;;  %v1074_v24 = vld [vmem:[%s2053_s4 + $0x38] sm:$0xff] }
 0xa85   :  { %v1289_v26 = vmul.f32 -1.442695, %v833_v23  ;;  %v1488_v22 = vpack.c.bf16 %v1072_v20, %v1071_v19  ;;  %v1073_v23 = vld [vmem:[%s2053_s4 + $0x30] sm:$0xff] }
 0xa86   :  { %v1290_v16 = vmul.f32 -1.442695, %v834_v25 }
 0xa87   :  { %1596 = vpow2.f32 %v1289_v26 }
 0xa88   :  { %1598 = vtanh.f32 %v834_v25  ;;  %v1491_v25 = vpack.c.bf16 %v1074_v24, %v1073_v23 }
 0xa91   :  { %v1597_v28 = vpop.eup %1596 }
 0xa92   :  { %v838_v29 = vadd.f32 1.0, %v1597_v28  ;;  %v1599_v31 = vpop.eup %1598 }
 0xa94   :  { %1600 = vrcp.f32 %v838_v29 }
 0xa95   :  { %1602 = vpow2.f32 %v1290_v16 }
 0xa9e   :  { %v1601_v32 = vpop.eup %1600 }
 0xa9f   :  { %v849_v33 = vmul.f32 %v1601_v32, %v1599_v31  ;;  %v1603_v52 = vpop.eup %1602  ;;  %v848_v53 = vmul.f32 %v1601_v32, %v749_v13 }
 0xaa0   :  { %v845_v35 = vadd.f32 1.0, %v1603_v52 }
 0xaa1   :  { %851 = vrot.lane.b32.xlu0 %v849_v33, %s1657_s2 }
 0xaa2   :  { %1604 = vrcp.f32 %v845_v35 }
 0xaac   :  { %v1605_v40 = vpop.eup %1604 }
 0xb13   :  { %v852_v36 = vpop.permute.xlu0 %851 }
 0xb14   :  { %v854_v38 = vadd.f32 %v852_v36, %v848_v53  ;;  %v1158_v53 = vld [vmem:[%s2055_s6] sm:$0xff]  ;;  %v1159_v36 = vld [vmem:[%s2055_s6 + $0x8] sm:$0xff] }
 0xb16   :  { %1606 = vtanh.f32 %v854_v38 }
 0xb20   :  { %v1607_v47 = vpop.eup %1606 }
 0xb21   :  { %v856_v41 = vmul.f32 %v1607_v47, %v1605_v40  ;;  %v1160_v47 = vld [vmem:[%s2055_s6 + $0x10] sm:$0xff] }
 0xb23   :  { %863 = vrot.lane.b32.xlu1 %v856_v41, %s1657_s2  ;;  %v1161_v41 = vld [vmem:[%s2055_s6 + $0x18] sm:$0xff] }
 0xb95   :  { %v864_v48 = vpop.permute.xlu1 %863 }
 0xb96   :  { %1291 = vmatmul.mubr.msk.f32.vlgmr.msra.gmra.mrb[8].mxu0 %vm233_vm1, %v864_v48  ;;  %v1497_v48 = vpack.c.bf16 %v1161_v41, %v1160_v47 }
 0xb97   :  { %1468 = vmatpush1.bf16.msra.mxu0 %v1746_v18  ;;  %1036 = vmatprep.mubr.f32.mxu0 %v1656_v7  ;;  %v188_v18 = vadd.f32 %v1881_v56, %v1893_v3  ;;  %v1658_v3 = vmov 0.0|0.0  }
 0xb98   :  { %1470 = vmatprep.subr.bf16.mxu0 %v1754_v21  ;;  %1481 = vmatprep.subr.bf16.mxu1 %v1658_v3 }
 0xb99   :  { %1483 = vmatpush3.bf16.msra.mxu1 %v1482_v14 }
 0xb9a   :  { %1484 = vmatprep.subr.bf16.mxu1 %v1658_v3 }
 0xb9b   :  { %1472 = vmatpush1.bf16.msra.mxu0 %v1775_v27 }
 0xb9c   :  { %1474 = vmatprep.subr.bf16.mxu0 %v1784_v30 }
 0xb9d   :  { %1486 = vmatpush3.bf16.msra.mxu1 %v1485_v17 }
 0xb9e   :  { %1487 = vmatprep.subr.bf16.mxu1 %v1658_v3 }
 0xb9f   :  { %1476 = vmatpush1.bf16.msra.mxu0 %v1799_v34 }
 0xba0   :  { %1478 = vmatprep.subr.bf16.mxu0 %v1809_v37 }
 0xba1   :  { %1489 = vmatpush3.bf16.msra.mxu1 %v1488_v22 }
 0xba2   :  { %1490 = vmatprep.subr.bf16.mxu1 %v1658_v3 }
 0xba3   :  { %1480 = vmatpush1.bf16.msra.mxu0 %v1818_v39 }
 0xba5   :  { %1492 = vmatpush3.bf16.msra.mxu1 %v1491_v25 }
 0xba6   :  { %1493 = vmatprep.subr.bf16.mxu1 %v1658_v3 }
 0xc69   :  { %v933_v43 = vpop.f32.mrb[8].mxu0 }
 0xc6a   :  { %v938_v44 = vadd.f32 %v933_v43, %v186_v42  ;;  %v935_v51 = vpop.f32.mrb[9].mxu0  ;;  %v1297_v42 = vld [vmem:[%s2054_s5] ss:$0 sm:$0xff]  ;;  %s1632_s5 = scalar_lea.vmem %s1252_s25, 128 }
 0xc6b   :  { %v939_v21 = vadd.f32 %v935_v51, %v188_v18  ;;  %p1633_p0 = scmp.ne.s32.totalorder %s1252_s25, %s1632_s5  ;;  %p1638_p2 = scmp.lt.s32.totalorder %s1632_s5, %s1632_s5 }
 0xc6c   :  { %v1292_v54 = vmul.f32 -1.442695, %v938_v44 }
 0xc6d   :  { %v1293_v39 = vmul.f32 -1.442695, %v939_v21  ;;  %p1639_p3 = por %p1638_p2, %p1637_p1 }
 0xc6e   :  { %1608 = vpow2.f32 %v1292_v54 }
 0xc6f   :  { %1610 = vtanh.f32 %v939_v21  ;;  %p1640_p4 = pnand %p1639_p3, %p1633_p0 }
 0xc78   :  { %v1609_v27 = vpop.eup %1608 }
 0xc79   :  { %v943_v30 = vadd.f32 1.0, %v1609_v27  ;;  %v1611_v34 = vpop.eup %1610 }
 0xc7b   :  { %1612 = vrcp.f32 %v943_v30 }
 0xc7c   :  { %1614 = vpow2.f32 %v1293_v39 }
 0xc85   :  { %v1613_v37 = vpop.eup %1612 }
 0xc86   :  { %v954_v57 = vmul.f32 %v1613_v37, %v1611_v34  ;;  %v1615_v55 = vpop.eup %1614  ;;  %v953_v56 = vmul.f32 %v1613_v37, %v854_v38  ;;  %v1494_v38 = vpack.c.bf16 %v1159_v36, %v1158_v53 }
 0xc87   :  { %v950_v58 = vadd.f32 1.0, %v1615_v55 }
 0xc88   :  { %956 = vrot.lane.b32.xlu0 %v954_v57, %s1657_s2 }
 0xc89   :  { %1616 = vrcp.f32 %v950_v58 }
 0xc93   :  { %v1617_v0 = vpop.eup %1616 }
 0xcfa   :  { %v957_v62 = vpop.permute.xlu0 %956 }
 0xcfb   :  { %v959_v63 = vadd.f32 %v957_v62, %v953_v56 }
 0xcfd   :  { %1618 = vtanh.f32 %v959_v63 }
 0xd07   :  { %v1619_v1 = vpop.eup %1618 }
 0xd08   :  { %v961_v2 = vmul.f32 %v1619_v1, %v1617_v0 }
 0xd0a   :  { %968 = vrot.lane.b32.xlu1 %v961_v2, %s1657_s2 }
 0xd7c   :  { %v969_v4 = vpop.permute.xlu1 %968 }
 0xd7d   :  { %1294 = vmatmul.mubr.msk.f32.vlgmr.msra.gmra.mrb[10].mxu0 %vm233_vm1, %v969_v4 }
 0xe50   :  { %v1038_v8 = vpop.f32.mrb[10].mxu0 }
 0xe51   :  { %v1043_v9 = vadd.f32 %v1038_v8, %v192_v5  ;;  %v1040_v10 = vpop.f32.mrb[11].mxu0 }
 0xe52   :  { %v1044_v11 = vadd.f32 %v1040_v10, %v194_v6 }
 0xe53   :  { %v1295_v49 = vmul.f32 -1.442695, %v1043_v9 }
 0xe54   :  { %v1296_v26 = vmul.f32 -1.442695, %v1044_v11 }
 0xe55   :  { %1620 = vpow2.f32 %v1295_v49 }
 0xe56   :  { %1622 = vtanh.f32 %v1044_v11 }
 0xe5f   :  { %v1621_v12 = vpop.eup %1620 }
 0xe60   :  { %v1048_v50 = vadd.f32 1.0, %v1621_v12  ;;  %v1623_v45 = vpop.eup %1622 }
 0xe62   :  { %1624 = vrcp.f32 %v1048_v50 }
 0xe63   :  { %1626 = vpow2.f32 %v1296_v26 }
 0xe6c   :  { %v1625_v13 = vpop.eup %1624 }
 0xe6d   :  { %v1059_v46 = vmul.f32 %v1625_v13, %v1623_v45  ;;  %v1627_v28 = vpop.eup %1626  ;;  %v1058_v31 = vmul.f32 %v1625_v13, %v959_v63 }
 0xe6e   :  { %v1055_v29 = vadd.f32 1.0, %v1627_v28 }
 0xe6f   :  { %1061 = vrot.lane.b32.xlu0 %v1059_v46, %s1657_s2 }
 0xe70   :  { %1628 = vrcp.f32 %v1055_v29 }
 0xe7a   :  { %v1629_v16 = vpop.eup %1628 }
 0xee1   :  { %v1062_v32 = vpop.permute.xlu0 %1061 }
 0xee2   :  { %v1064_v33 = vadd.f32 %v1062_v32, %v1058_v31 }
 0xee4   :  { %1630 = vtanh.f32 %v1064_v33 }
 0xeee   :  { %v1631_v52 = vpop.eup %1630 }
 0xeef   :  { %v1066_v35 = vmul.f32 %v1631_v52, %v1629_v16 }
 0xef1   :  { %1083 = vrot.lane.b32.xlu1 %v1066_v35, %s1657_s2 }
 0xf63   :  { %v1084_v40 = vpop.permute.xlu1 %1083 }
 0xf64   :  { %1332 = vmatmul.mubr.msk.f32.vlgmr.msra.gmra.mrb[16].mxu1 %vm233_vm1, %v1084_v40 }
 0xf65   :  { %1495 = vmatpush3.bf16.msra.mxu1 %v1494_v38  ;;  %1342 = vmatprep.mubr.msk.f32.mxu1 %vm1659_vm2, %v1656_v7  ;;  %v1299_v7 = vld [vmem:[%s2056_s7] ss:$0 sm:$0xff] }
 0xf66   :  { %1496 = vmatprep.subr.bf16.mxu1 %v1658_v3 }
 0xf69   :  { %1498 = vmatpush3.bf16.msra.mxu1 %v1497_v48 }
0x1037   :  { %v1153_v18 = vpop.f32.mrb[16].mxu1 }
0x1038   :  { %v1154_v43 = vadd.f32 %v1297_v42, %v1153_v18  ;;  %v1333_v44 = vpop.f32.mrb[17].mxu1 }
0x103a   :  { %v1157_v51 = vmax.f32 %v1154_v43, 0.0 }
0x103c   :  { %1343 = vmatmul.mubr.msk.f32.vlgmr.msra.gmra.mrb[18].mxu1 %vm58_vm0, %v1157_v51 }
0x110f   :  { %v1238_v21 = vpop.f32.mrb[18].mxu1 }
0x1110   :  { %v1239_v54 = vadd.f32 %v1299_v7, %v1238_v21  ;;  %v1344_v27 = vpop.f32.mrb[19].mxu1 }
0x1112   :  { %v1242_v30 = vmax.f32 %v1239_v54, 0.0 }
0x1114   :  { %1244 = vst.msk [vmem:[#allocation3] sm:$0xff] %vm1243_vm3, %v1242_v30 }
0x1115   :  { %1643 = shalt.err (!%p1640_p4)
}
0x1116   :  { %s1644_s7 = scalar_lea.hbm %s2057_s8, 128 }
0x1117   :  { %p1645_p5 = scmp.ne.s32.totalorder %s2057_s8, %s1644_s7  ;;  %p1648_p6 = scmp.lt.u32.totalorder %s1644_s7, %s2057_s8 }
0x1119   :  { %p1650_p7 = pnand %p1648_p6, %p1645_p5 }
0x111b   :  { %1653 = shalt.err (!%p1650_p7)
}
0x111c   :  { %1254 = dma.vmem_to_hbm [thread:$0]  %s1252_s25, 128, %s2057_s8, [#allocation4]  }
0x111d   :  { %1654 = dma.done.wait [#allocation4], 128  }
0x111e   :  { %1655 = vsyncadd [#allocation4], 4294967168 }
0x111f   :  { %1258 = vsyncpa [#allocation4], 1 }

</bundles_post_ra>
